<compile_context>
chip_gen: v7x
topology: tpu7x:2x2x1
jax: 0.10.0
libtpu: 0.0.40
codegen_flags: <defaults>
</compile_context>

<pallas_src>
import functools

import jax
import jax.numpy as jnp
from jax.experimental import pallas as pl
from jax.experimental.pallas import tpu as pltpu

LANE = 128
SUBLANE = 8
NEG_SLOPE = 0.01  # F.leaky_relu default negative_slope


def _latents_to_decoder_kernel(x_ref, w_ref, b_ref, o_ref):
    # x_ref: (TILE_B, L), w_ref: (L, N_pad), b_ref: (1, N_pad), o_ref: (TILE_B, N_pad)
    y = jnp.dot(x_ref[...], w_ref[...], preferred_element_type=jnp.float32)
    y = y + b_ref[...]  # single bias add per tile; b load stays hoisted (no inner loop)
    o_ref[...] = jnp.where(y > 0, y, NEG_SLOPE * y).astype(o_ref.dtype)


def _round_up(x, m):
    return (x + m - 1) // m * m


@functools.partial(jax.jit, static_argnames=("tile_b",))
def latents_to_decoder(x, w, b, *, tile_b=1024):
    """x: (B, num_latents) f32, w: (num_latents, 49) f32, b: (49,) f32 -> (B, 49) f32."""
    B, L = x.shape
    out_dim = w.shape[1]

    # Lane-dense output: zero-pad the 49-wide output to a full 128-lane register.
    n_pad = _round_up(out_dim, LANE)
    w_p = jnp.zeros((L, n_pad), w.dtype).at[:, :out_dim].set(w)
    b_p = jnp.zeros((1, n_pad), b.dtype).at[0, :out_dim].set(b)

    # Batch tiling: biggest tile <= tile_b that covers B, rounded to the sublane quantum.
    tb = min(tile_b, _round_up(B, SUBLANE))
    b_padded = _round_up(B, tb)
    if b_padded != B:
        x = jnp.pad(x, ((0, b_padded - B), (0, 0)))

    grid = (b_padded // tb,)

    cost = pl.CostEstimate(
        flops=2 * B * L * out_dim,
        transcendentals=0,
        bytes_accessed=4 * (B * L + L * out_dim + out_dim + B * out_dim),
    )

    out = pl.pallas_call(
        _latents_to_decoder_kernel,
        out_shape=jax.ShapeDtypeStruct((b_padded, n_pad), x.dtype),
        grid_spec=pltpu.PrefetchScalarGridSpec(
            num_scalar_prefetch=0,
            grid=grid,
            in_specs=[
                pl.BlockSpec((tb, L), lambda i: (i, 0)),        # x: tiled over batch
                pl.BlockSpec((L, n_pad), lambda i: (0, 0)),     # W: replicated
                pl.BlockSpec((1, n_pad), lambda i: (0, 0)),     # b: replicated
            ],
            out_specs=pl.BlockSpec((tb, n_pad), lambda i: (i, 0)),
        ),
        compiler_params=pltpu.CompilerParams(
            dimension_semantics=("parallel",),  # shard batch tiles across TCs on v7x
        ),
        cost_estimate=cost,
    )(x, w_p, b_p)

    # Slice back to the logical (B, 49) result.
    return out[:B, :out_dim]


def reference(x, w, b):
    y = x @ w + b
    return jnp.where(y > 0, y, NEG_SLOPE * y)


if __name__ == "__main__":
    num_latents = 32
    batch = 8
    out_dim = 49

    key = jax.random.PRNGKey(0)
    kx, kw, kb = jax.random.split(key, 3)

    # Deterministic parameter init mimicking nn.Linear: U(-1/sqrt(fan_in), 1/sqrt(fan_in))
    bound = 1.0 / (num_latents ** 0.5)
    w = jax.random.uniform(kw, (num_latents, out_dim), jnp.float32, -bound, bound)
    b = jax.random.uniform(kb, (out_dim,), jnp.float32, -bound, bound)

    x = jax.random.normal(kx, (batch, num_latents), jnp.float32)

    out = latents_to_decoder(x, w, b)
    out = jax.block_until_ready(out)

    ref = reference(x, w, b)
    assert out.shape == (batch, out_dim)
    assert jnp.allclose(out, ref, atol=1e-5, rtol=1e-5)
    print("KERNEL_OK")
</pallas_src>

<mosaic_0001>
module attributes {stable_mosaic.version = 11 : i64} {
  func.func @_latents_to_decoder_kernel(%arg0: i32, %arg1: memref<8x32xf32, #tpu.memory_space<vmem>>, %arg2: memref<32x128xf32, #tpu.memory_space<vmem>>, %arg3: memref<1x128xf32, #tpu.memory_space<vmem>>, %arg4: memref<8x128xf32, #tpu.memory_space<vmem>>) attributes {dimension_semantics = [#tpu.dimension_semantics<parallel>], iteration_bounds = array<i64: 1>, scalar_prefetch = 0 : i64, scratch_operands = 0 : i64, tpu.core_type = #tpu.core_type<tc>, window_params = [{transform_indices = @transform_0, window_bounds = array<i64: 8, 32>}, {pipeline_mode = #tpu.pipeline_mode<synchronous>, transform_indices = @transform_1, window_bounds = array<i64: 32, 128>}, {pipeline_mode = #tpu.pipeline_mode<synchronous>, transform_indices = @transform_2, window_bounds = array<i64: 1, 128>}, {transform_indices = @transform_3, window_bounds = array<i64: 8, 128>}]} {
    %c0 = arith.constant 0 : index
    %c0_0 = arith.constant 0 : index
    %0 = vector.load %arg1[%c0, %c0_0] : memref<8x32xf32, #tpu.memory_space<vmem>>, vector<8x32xf32>
    %c0_1 = arith.constant 0 : index
    %c0_2 = arith.constant 0 : index
    %1 = vector.load %arg2[%c0_1, %c0_2] : memref<32x128xf32, #tpu.memory_space<vmem>>, vector<32x128xf32>
    %cst = arith.constant dense<0.000000e+00> : vector<8x128xf32>
    %2 = tpu.matmul %0, %1, %cst {dimension_numbers = #tpu.dot_dimension_numbers<[1], [0], [0], [1], [0, 0, 1, 1], [], []>} : vector<8x32xf32>, vector<32x128xf32>, vector<8x128xf32> -> vector<8x128xf32>
    %c0_3 = arith.constant 0 : index
    %c0_4 = arith.constant 0 : index
    %3 = vector.load %arg3[%c0_3, %c0_4] : memref<1x128xf32, #tpu.memory_space<vmem>>, vector<1x128xf32>
    %4 = vector.broadcast %3 : vector<1x128xf32> to vector<8x128xf32>
    %5 = arith.addf %2, %4 : vector<8x128xf32>
    %cst_5 = arith.constant 0.000000e+00 : f32
    %6 = vector.broadcast %cst_5 : f32 to vector<8x128xf32>
    %7 = arith.cmpf ogt, %5, %6 : vector<8x128xf32>
    %cst_6 = arith.constant 0.00999999977 : f32
    %8 = vector.broadcast %cst_6 : f32 to vector<8x128xf32>
    %9 = arith.mulf %8, %5 : vector<8x128xf32>
    %10 = arith.select %7, %5, %9 : vector<8x128xi1>, vector<8x128xf32>
    %c0_7 = arith.constant 0 : index
    %c0_8 = arith.constant 0 : index
    %11 = vector.load %arg4[%c0_7, %c0_8] : memref<8x128xf32, #tpu.memory_space<vmem>>, vector<8x128xf32>
    tpu.vector_store %arg4[%c0_7, %c0_8], %10 {strides = array<i32>} : memref<8x128xf32, #tpu.memory_space<vmem>>, vector<8x128xf32>,
    return
  }
  func.func @transform_0(%arg0: i32) -> (i32, i32) {
    %c0_i32 = arith.constant 0 : i32
    %c0_i32_0 = arith.constant 0 : i32
    return %arg0, %c0_i32 : i32, i32
  }
  func.func @transform_1(%arg0: i32) -> (i32, i32) {
    %c0_i32 = arith.constant 0 : i32
    %c0_i32_0 = arith.constant 0 : i32
    %c0_i32_1 = arith.constant 0 : i32
    return %c0_i32, %c0_i32_0 : i32, i32
  }
  func.func @transform_2(%arg0: i32) -> (i32, i32) {
    %c0_i32 = arith.constant 0 : i32
    %c0_i32_0 = arith.constant 0 : i32
    %c0_i32_1 = arith.constant 0 : i32
    return %c0_i32, %c0_i32_0 : i32, i32
  }
  func.func @transform_3(%arg0: i32) -> (i32, i32) {
    %c0_i32 = arith.constant 0 : i32
    %c0_i32_0 = arith.constant 0 : i32
    return %arg0, %c0_i32 : i32, i32
  }
}

</mosaic_0001>

<bundles_post_ra>
// kernel: latents_to_decoder.1
= control target key start
LH: loop header
LB: loop body
LE: loop exit
PB: predicated region body
PF: predicated region fallthrough
CT: control target
= control target key end

     0   :  { %v171_v3 = vmov 0.0|0.0   ;;  %vm172_vm0 = vmmov 0   ;;  %v173_v6 = vmov 0.0   ;;  %s225_s0 = inlined_call_operand.vmem [shape: f32[8,32], index: 0, kind: input, shape index: {}]   ;;  %s226_s1 = inlined_call_operand.vmem [shape: f32[32,128], index: 1, kind: input, shape index: {}]   ;;  %s227_s2 = inlined_call_operand.vmem [shape: f32[1,128], index: 2, kind: input, shape index: {}]   ;;  %s228_s3 = inlined_call_operand.hbm [shape: f32[8,128], index: 3, kind: output, shape index: {}]  }
   0x1   :  { %v16_v0 = vld [vmem:[%s226_s1] sm:$0xff]  ;;  %v17_v1 = vld [vmem:[%s226_s1 + $0x8] sm:$0xff]  ;;  %v18_v2 = vld [vmem:[%s226_s1 + $0x10] sm:$0xff]  ;;  %137 = vmatprep.subr.bf16.mxu0 %v171_v3  ;;  %134 = vmatprep.mubr.msk.f32.mxu0 %vm172_vm0, %v173_v6 }
   0x2   :  { %v138_v4 = vpack.c.bf16 %v17_v1, %v16_v0  ;;  %v19_v5 = vld [vmem:[%s226_s1 + $0x18] sm:$0xff] }
   0x3   :  { %8 = vsyncpa [#allocation3], 0  ;;  %v141_v7 = vpack.c.bf16 %v19_v5, %v18_v2  ;;  %v15_v8 = vld [vmem:[%s225_s0] sm:$0xff]  ;;  %vm27_vm1 = vcmask 261120   ;;  %s174_s1 = smov [#allocation2]  }
   0x4   :  { %139 = vmatpush3.bf16.msra.mxu0 %v138_v4  ;;  %v119_v9 = vld [vmem:[%s227_s2] ss:$0 sm:$0xff]  ;;  %s111_s24 = sshll.u32 %s174_s1, 4  ;;  %s112_s24 = int_to_ptr.vmem [resolvable:$true] %s111_s24 }
   0x5   :  { %140 = vmatprep.subr.bf16.mxu0 %v171_v3  ;;  %s147_s25 = scalar_lea.vmem %s112_s24, 128  ;;  %p152_p1 = scmp.lt.s32.totalorder %s112_s24, %s112_s24 }
   0x6   :  { %p148_p0 = scmp.ne.s32.totalorder %s112_s24, %s147_s25  ;;  %p153_p2 = scmp.lt.s32.totalorder %s147_s25, %s147_s25 }
   0x8   :  { %142 = vmatpush3.bf16.msra.mxu0 %v141_v7  ;;  %p154_p3 = por %p153_p2, %p152_p1 }
   0xa   :  { %p155_p4 = pnand %p154_p3, %p148_p0 }
   0xb   :  { %135 = vmatmul.mubr.msk.f32.vlgmr.msra.gmra.mrb[0].mxu0 %vm27_vm1, %v15_v8 }
  0xde   :  { %v97_v10 = vpop.f32.mrb[0].mxu0 }
  0xdf   :  { %v98_v11 = vadd.f32 %v119_v9, %v97_v10  ;;  %v136_v12 = vpop.f32.mrb[1].mxu0 }
  0xe1   :  { %v102_v13 = vmul.f32 0.01, %v98_v11  ;;  %vm101_vm2 = vcmp.gt.f32.partialorder %v98_v11, 0.0 }
  0xe3   :  { %v103_v14 = vsel %vm101_vm2, %v98_v11, %v102_v13 }
  0xe4   :  { %104 = vst [vmem:[#allocation2] sm:$0xff] %v103_v14 }
  0xe5   :  { %158 = shalt.err (!%p155_p4)
}
  0xe6   :  { %s159_s2 = scalar_lea.hbm %s228_s3, 128 }
  0xe7   :  { %p160_p5 = scmp.ne.s32.totalorder %s228_s3, %s159_s2  ;;  %p163_p6 = scmp.lt.u32.totalorder %s159_s2, %s228_s3 }
  0xe9   :  { %p165_p7 = pnand %p163_p6, %p160_p5 }
  0xeb   :  { %168 = shalt.err (!%p165_p7)
}
  0xec   :  { %114 = dma.vmem_to_hbm [thread:$0]  %s112_s24, 128, %s228_s3, [#allocation3]  }
  0xed   :  { %169 = dma.done.wait [#allocation3], 128  }
  0xee   :  { %170 = vsyncadd [#allocation3], 4294967168 }
  0xef   :  { %118 = vsyncpa [#allocation3], 1 }

</bundles_post_ra>
